<compile_context>
chip_gen: v6e
topology: v6e:2x2x1
jax: 0.10.0
libtpu: 0.0.40
codegen_flags: <defaults>
</compile_context>

<pallas_src>
import jax
import jax.numpy as jnp
import numpy as np
from jax.experimental import pallas as pl
from jax.experimental.pallas import tpu as pltpu

C_OUT = 2          # ConvTranspose2d(1, 2, ...)
KH, KW = 3, 2      # kernel size
EPS = 1e-5         # InstanceNorm2d default eps


# ------------------------------ Pallas kernel --------------------------------
def _deconv_in_prelu_kernel(xp_ref, prm_ref, o_ref):
    """Fused ConvTranspose2d + InstanceNorm2d(affine) + PReLU (lane-dense layout).

    xp_ref : (B, Wp, Hp) VMEM   zero-dilated + padded conv input, time on sublanes,
                                freq*2 on lanes.  Wp = W + 2, Hp = 2H + 2.
    prm_ref: (C_OUT, 10) SMEM   per-channel [6 flipped conv taps, bias, gamma, beta, alpha]
    o_ref  : (B, C_OUT, Wo, Ho) VMEM, Wo = W + 1, Ho = 2H  (wrapper transposes back to NCHW)
    """
    B = xp_ref.shape[0]
    Wo, Ho = o_ref.shape[2], o_ref.shape[3]
    inv_n = 1.0 / float(Ho * Wo)

    for b in range(B):                                # static unroll, tiny batch
        # The 6 shifted views of the dilated/padded input == the 6 conv taps.
        # Order (kh-major, kw-minor) matches the packed parameter columns 0..5.
        taps = [xp_ref[b, kw:kw + Wo, kh:kh + Ho]
                for kh in range(KH) for kw in range(KW)]
        for c in range(C_OUT):                        # static unroll, 2 channels
            # Transposed conv as 6 scalar-broadcast FMAs on the VPU (+ bias).
            y = taps[0] * prm_ref[c, 0]
            for t in range(1, KH * KW):
                y = y + taps[t] * prm_ref[c, t]
            y = y + prm_ref[c, KH * KW]                              # conv bias
            # Two-pass InstanceNorm statistics (biased variance, matches PyTorch).
            mean = jnp.sum(y, axis=(0, 1), keepdims=True) * inv_n    # (1, 1)
            d = y - mean
            var = jnp.sum(d * d, axis=(0, 1), keepdims=True) * inv_n
            yn = d * jax.lax.rsqrt(var + EPS)
            yn = yn * prm_ref[c, 7] + prm_ref[c, 8]                  # IN affine
            o_ref[b, c] = jnp.where(yn >= 0.0, yn, prm_ref[c, 9] * yn)   # PReLU


# -------------------------------- JAX wrapper ---------------------------------
@jax.jit
def channel_decoder_sf10(x, w, b, gamma, beta, alpha):
    """x: (B, T, F) float32.  Returns (B, 2, 4*F, T//2 + 1) (NCHW), matching PyTorch."""
    B, T, F = x.shape
    te = T // 2
    H, W = 2 * F, te
    Ho, Wo = 2 * H, W + 1

    # PyTorch's unsqueeze/permute/view chain yields a conv input of shape (B, 2F, te) with
    # element [b, 2f+m, t] = x[b, m*te + t, f].  Build it directly TRANSPOSED (time on
    # sublanes, 2F on lanes) so the kernel's vregs are lane-dense.
    xc_t = jnp.transpose(x.reshape(B, 2, te, F), (0, 2, 3, 1)).reshape(B, te, 2 * F)

    # ConvTranspose2d(k=(3,2), s=(2,1), p=(1,0), op=(1,0)) == stride-1 correlation of the
    # flipped kernel over the zero-dilated input padded (1, 2) along H and (1, 1) along W.
    # One XLA pad op; everything else happens inside the Pallas kernel.
    xp = jax.lax.pad(xc_t.astype(jnp.float32), jnp.float32(0.0),
                     ((0, 0, 0), (1, 1, 0), (1, 2, 1)))              # (B, W+2, 2H+2)

    # Flip/transpose the ConvTranspose weight (Cin=1, Cout, KH, KW) and pack all
    # per-channel parameters into a single SMEM array.
    wf = jnp.transpose(w, (1, 0, 2, 3))[:, 0, ::-1, ::-1]            # (C_OUT, KH, KW)
    prm = jnp.concatenate(
        [wf.reshape(C_OUT, KH * KW),
         b.reshape(C_OUT, 1), gamma.reshape(C_OUT, 1),
         beta.reshape(C_OUT, 1), alpha.reshape(C_OUT, 1)],
        axis=1).astype(jnp.float32)                                  # (C_OUT, 10)

    out_t = pl.pallas_call(
        _deconv_in_prelu_kernel,
        out_shape=jax.ShapeDtypeStruct((B, C_OUT, Wo, Ho), jnp.float32),
        in_specs=[
            pl.BlockSpec(memory_space=pltpu.MemorySpace.VMEM),
            pl.BlockSpec(memory_space=pltpu.MemorySpace.SMEM),
        ],
        out_specs=pl.BlockSpec(memory_space=pltpu.MemorySpace.VMEM),
    )(xp, prm)
    # Back to PyTorch's NCHW output layout (B, 2, 4F, te+1); ~9 KB, negligible cost.
    return jnp.transpose(out_t, (0, 1, 3, 2))


# -------------------------- pure-JAX reference (check) ------------------------
def channel_decoder_sf10_ref(x, w, b, gamma, beta, alpha):
    B, T, F = x.shape
    te = T // 2
    xc = jnp.transpose(x, (0, 2, 1)).reshape(B, F, 2, te).reshape(B, 1, 2 * F, te)
    wr = jnp.transpose(w, (1, 0, 2, 3))[:, :, ::-1, ::-1]            # (O, I, KH, KW) flipped
    y = jax.lax.conv_general_dilated(
        xc, wr, window_strides=(1, 1),
        padding=((1, 2), (1, 1)),
        lhs_dilation=(2, 1),
        dimension_numbers=("NCHW", "OIHW", "NCHW"))
    y = y + b[None, :, None, None]
    mean = jnp.mean(y, axis=(2, 3), keepdims=True)
    var = jnp.mean(jnp.square(y - mean), axis=(2, 3), keepdims=True)
    yn = (y - mean) / jnp.sqrt(var + EPS)
    yn = yn * gamma[None, :, None, None] + beta[None, :, None, None]
    return jnp.where(yn >= 0.0, yn, alpha[None, :, None, None] * yn)


# ------------------------------------ main -------------------------------------
if __name__ == "__main__":
    key = jax.random.PRNGKey(0)
    kx, kw_, kb, kg, kbt = jax.random.split(key, 5)

    B, T, F = 2, 16, 16            # x: (batch, subsampled_time, subsampled_freq); T even
    x = jax.random.normal(kx, (B, T, F), jnp.float32)
    w = 0.3 * jax.random.normal(kw_, (1, C_OUT, KH, KW), jnp.float32)  # ConvT weight (Cin,Cout,kH,kW)
    b = 0.1 * jax.random.normal(kb, (C_OUT,), jnp.float32)
    gamma = 1.0 + 0.1 * jax.random.normal(kg, (C_OUT,), jnp.float32)
    beta = 0.1 * jax.random.normal(kbt, (C_OUT,), jnp.float32)
    alpha = 0.25 * jnp.ones((C_OUT,), jnp.float32)                     # PReLU default init

    out = jax.block_until_ready(channel_decoder_sf10(x, w, b, gamma, beta, alpha))
    ref = jax.block_until_ready(channel_decoder_sf10_ref(x, w, b, gamma, beta, alpha))
    np.testing.assert_allclose(np.asarray(out), np.asarray(ref), rtol=2e-3, atol=2e-3)
    print("KERNEL_OK")
</pallas_src>

<mosaic_0001>
module attributes {stable_mosaic.version = 11 : i64} {
  func.func @_deconv_in_prelu_kernel(%arg0: memref<2x10x66xf32, #tpu.memory_space<vmem>>, %arg1: memref<2x10xf32, #tpu.memory_space<smem>>, %arg2: memref<2x2x9x64xf32, #tpu.memory_space<vmem>>) attributes {dimension_semantics = [], scalar_prefetch = 0 : i64, scratch_operands = 0 : i64, tpu.core_type = #tpu.core_type<tc>} {
    %c0 = arith.constant 0 : index
    %c0_0 = arith.constant 0 : index
    %c0_1 = arith.constant 0 : index
    %0 = vector.load %arg0[%c0, %c0_0, %c0_1] : memref<2x10x66xf32, #tpu.memory_space<vmem>>, vector<1x9x64xf32>
    %1 = vector.shape_cast %0 : vector<1x9x64xf32> to vector<9x64xf32>
    %c0_2 = arith.constant 0 : index
    %c1 = arith.constant 1 : index
    %c0_3 = arith.constant 0 : index
    %2 = vector.load %arg0[%c0_2, %c1, %c0_3] : memref<2x10x66xf32, #tpu.memory_space<vmem>>, vector<1x9x64xf32>
    %3 = vector.shape_cast %2 : vector<1x9x64xf32> to vector<9x64xf32>
    %c0_4 = arith.constant 0 : index
    %c0_5 = arith.constant 0 : index
    %c1_6 = arith.constant 1 : index
    %4 = vector.load %arg0[%c0_4, %c0_5, %c1_6] : memref<2x10x66xf32, #tpu.memory_space<vmem>>, vector<1x9x64xf32>
    %5 = vector.shape_cast %4 : vector<1x9x64xf32> to vector<9x64xf32>
    %c0_7 = arith.constant 0 : index
    %c1_8 = arith.constant 1 : index
    %c1_9 = arith.constant 1 : index
    %6 = vector.load %arg0[%c0_7, %c1_8, %c1_9] : memref<2x10x66xf32, #tpu.memory_space<vmem>>, vector<1x9x64xf32>
    %7 = vector.shape_cast %6 : vector<1x9x64xf32> to vector<9x64xf32>
    %c0_10 = arith.constant 0 : index
    %c0_11 = arith.constant 0 : index
    %c2 = arith.constant 2 : index
    %8 = vector.load %arg0[%c0_10, %c0_11, %c2] : memref<2x10x66xf32, #tpu.memory_space<vmem>>, vector<1x9x64xf32>
    %9 = vector.shape_cast %8 : vector<1x9x64xf32> to vector<9x64xf32>
    %c0_12 = arith.constant 0 : index
    %c1_13 = arith.constant 1 : index
    %c2_14 = arith.constant 2 : index
    %10 = vector.load %arg0[%c0_12, %c1_13, %c2_14] : memref<2x10x66xf32, #tpu.memory_space<vmem>>, vector<1x9x64xf32>
    %11 = vector.shape_cast %10 : vector<1x9x64xf32> to vector<9x64xf32>
    %c0_15 = arith.constant 0 : index
    %c0_16 = arith.constant 0 : index
    %12 = memref.load %arg1[%c0_15, %c0_16] : memref<2x10xf32, #tpu.memory_space<smem>>
    %13 = vector.broadcast %12 : f32 to vector<9x64xf32>
    %14 = arith.mulf %1, %13 : vector<9x64xf32>
    %c0_17 = arith.constant 0 : index
    %c1_18 = arith.constant 1 : index
    %15 = memref.load %arg1[%c0_17, %c1_18] : memref<2x10xf32, #tpu.memory_space<smem>>
    %16 = vector.broadcast %15 : f32 to vector<9x64xf32>
    %17 = arith.mulf %3, %16 : vector<9x64xf32>
    %18 = arith.addf %14, %17 : vector<9x64xf32>
    %c0_19 = arith.constant 0 : index
    %c2_20 = arith.constant 2 : index
    %19 = memref.load %arg1[%c0_19, %c2_20] : memref<2x10xf32, #tpu.memory_space<smem>>
    %20 = vector.broadcast %19 : f32 to vector<9x64xf32>
    %21 = arith.mulf %5, %20 : vector<9x64xf32>
    %22 = arith.addf %18, %21 : vector<9x64xf32>
    %c0_21 = arith.constant 0 : index
    %c3 = arith.constant 3 : index
    %23 = memref.load %arg1[%c0_21, %c3] : memref<2x10xf32, #tpu.memory_space<smem>>
    %24 = vector.broadcast %23 : f32 to vector<9x64xf32>
    %25 = arith.mulf %7, %24 : vector<9x64xf32>
    %26 = arith.addf %22, %25 : vector<9x64xf32>
    %c0_22 = arith.constant 0 : index
    %c4 = arith.constant 4 : index
    %27 = memref.load %arg1[%c0_22, %c4] : memref<2x10xf32, #tpu.memory_space<smem>>
    %28 = vector.broadcast %27 : f32 to vector<9x64xf32>
    %29 = arith.mulf %9, %28 : vector<9x64xf32>
    %30 = arith.addf %26, %29 : vector<9x64xf32>
    %c0_23 = arith.constant 0 : index
    %c5 = arith.constant 5 : index
    %31 = memref.load %arg1[%c0_23, %c5] : memref<2x10xf32, #tpu.memory_space<smem>>
    %32 = vector.broadcast %31 : f32 to vector<9x64xf32>
    %33 = arith.mulf %11, %32 : vector<9x64xf32>
    %34 = arith.addf %30, %33 : vector<9x64xf32>
    %c0_24 = arith.constant 0 : index
    %c6 = arith.constant 6 : index
    %35 = memref.load %arg1[%c0_24, %c6] : memref<2x10xf32, #tpu.memory_space<smem>>
    %36 = vector.broadcast %35 : f32 to vector<9x64xf32>
    %37 = arith.addf %34, %36 : vector<9x64xf32>
    %38 = vector.shape_cast %37 : vector<9x64xf32> to vector<1x9x64xf32>
    %cst = arith.constant dense<0.000000e+00> : vector<1xf32>
    %39 = vector.multi_reduction <add>, %38, %cst [1, 2] : vector<1x9x64xf32> to vector<1xf32>
    %40 = vector.shape_cast %39 : vector<1xf32> to vector<1x1x1xf32>
    %41 = vector.extract %40[0, 0, 0] : f32 from vector<1x1x1xf32>
    %42 = vector.broadcast %41 : f32 to vector<1x1xf32>
    %cst_25 = arith.constant 0.00173611112 : f32
    %43 = vector.broadcast %cst_25 : f32 to vector<1x1xf32>
    %44 = arith.mulf %42, %43 : vector<1x1xf32>
    %45 = vector.broadcast %44 : vector<1x1xf32> to vector<9x64xf32>
    %46 = arith.subf %37, %45 : vector<9x64xf32>
    %47 = arith.mulf %46, %46 : vector<9x64xf32>
    %48 = vector.shape_cast %47 : vector<9x64xf32> to vector<1x9x64xf32>
    %cst_26 = arith.constant dense<0.000000e+00> : vector<1xf32>
    %49 = vector.multi_reduction <add>, %48, %cst_26 [1, 2] : vector<1x9x64xf32> to vector<1xf32>
    %50 = vector.shape_cast %49 : vector<1xf32> to vector<1x1x1xf32>
    %51 = vector.extract %50[0, 0, 0] : f32 from vector<1x1x1xf32>
    %52 = vector.broadcast %51 : f32 to vector<1x1xf32>
    %cst_27 = arith.constant 0.00173611112 : f32
    %53 = vector.broadcast %cst_27 : f32 to vector<1x1xf32>
    %54 = arith.mulf %52, %53 : vector<1x1xf32>
    %cst_28 = arith.constant 9.99999974E-6 : f32
    %55 = vector.broadcast %cst_28 : f32 to vector<1x1xf32>
    %56 = arith.addf %54, %55 : vector<1x1xf32>
    %57 = math.rsqrt %56 : vector<1x1xf32>
    %58 = vector.broadcast %57 : vector<1x1xf32> to vector<9x64xf32>
    %59 = arith.mulf %46, %58 : vector<9x64xf32>
    %c0_29 = arith.constant 0 : index
    %c7 = arith.constant 7 : index
    %60 = memref.load %arg1[%c0_29, %c7] : memref<2x10xf32, #tpu.memory_space<smem>>
    %61 = vector.broadcast %60 : f32 to vector<9x64xf32>
    %62 = arith.mulf %59, %61 : vector<9x64xf32>
    %c0_30 = arith.constant 0 : index
    %c8 = arith.constant 8 : index
    %63 = memref.load %arg1[%c0_30, %c8] : memref<2x10xf32, #tpu.memory_space<smem>>
    %64 = vector.broadcast %63 : f32 to vector<9x64xf32>
    %65 = arith.addf %62, %64 : vector<9x64xf32>
    %cst_31 = arith.constant 0.000000e+00 : f32
    %66 = vector.broadcast %cst_31 : f32 to vector<9x64xf32>
    %67 = arith.cmpf oge, %65, %66 : vector<9x64xf32>
    %c0_32 = arith.constant 0 : index
    %c9 = arith.constant 9 : index
    %68 = memref.load %arg1[%c0_32, %c9] : memref<2x10xf32, #tpu.memory_space<smem>>
    %69 = vector.broadcast %68 : f32 to vector<9x64xf32>
    %70 = arith.mulf %69, %65 : vector<9x64xf32>
    %71 = arith.select %67, %65, %70 : vector<9x64xi1>, vector<9x64xf32>
    %c0_33 = arith.constant 0 : index
    %c0_34 = arith.constant 0 : index
    %c0_35 = arith.constant 0 : index
    %c0_36 = arith.constant 0 : index
    %72 = vector.load %arg2[%c0_33, %c0_34, %c0_35, %c0_36] : memref<2x2x9x64xf32, #tpu.memory_space<vmem>>, vector<1x1x9x64xf32>
    %73 = vector.shape_cast %72 : vector<1x1x9x64xf32> to vector<9x64xf32>
    %74 = vector.shape_cast %71 : vector<9x64xf32> to vector<1x1x9x64xf32>
    tpu.vector_store %arg2[%c0_33, %c0_34, %c0_35, %c0_36], %74 {strides = array<i32>} : memref<2x2x9x64xf32, #tpu.memory_space<vmem>>, vector<1x1x9x64xf32>,
    %c1_37 = arith.constant 1 : index
    %c0_38 = arith.constant 0 : index
    %75 = memref.load %arg1[%c1_37, %c0_38] : memref<2x10xf32, #tpu.memory_space<smem>>
    %76 = vector.broadcast %75 : f32 to vector<9x64xf32>
    %77 = arith.mulf %1, %76 : vector<9x64xf32>
    %c1_39 = arith.constant 1 : index
    %c1_40 = arith.constant 1 : index
    %78 = memref.load %arg1[%c1_39, %c1_40] : memref<2x10xf32, #tpu.memory_space<smem>>
    %79 = vector.broadcast %78 : f32 to vector<9x64xf32>
    %80 = arith.mulf %3, %79 : vector<9x64xf32>
    %81 = arith.addf %77, %80 : vector<9x64xf32>
    %c1_41 = arith.constant 1 : index
    %c2_42 = arith.constant 2 : index
    %82 = memref.load %arg1[%c1_41, %c2_42] : memref<2x10xf32, #tpu.memory_space<smem>>
    %83 = vector.broadcast %82 : f32 to vector<9x64xf32>
    %84 = arith.mulf %5, %83 : vector<9x64xf32>
    %85 = arith.addf %81, %84 : vector<9x64xf32>
    %c1_43 = arith.constant 1 : index
    %c3_44 = arith.constant 3 : index
    %86 = memref.load %arg1[%c1_43, %c3_44] : memref<2x10xf32, #tpu.memory_space<smem>>
    %87 = vector.broadcast %86 : f32 to vector<9x64xf32>
    %88 = arith.mulf %7, %87 : vector<9x64xf32>
    %89 = arith.addf %85, %88 : vector<9x64xf32>
    %c1_45 = arith.constant 1 : index
    %c4_46 = arith.constant 4 : index
    %90 = memref.load %arg1[%c1_45, %c4_46] : memref<2x10xf32, #tpu.memory_space<smem>>
    %91 = vector.broadcast %90 : f32 to vector<9x64xf32>
    %92 = arith.mulf %9, %91 : vector<9x64xf32>
    %93 = arith.addf %89, %92 : vector<9x64xf32>
    %c1_47 = arith.constant 1 : index
    %c5_48 = arith.constant 5 : index
    %94 = memref.load %arg1[%c1_47, %c5_48] : memref<2x10xf32, #tpu.memory_space<smem>>
    %95 = vector.broadcast %94 : f32 to vector<9x64xf32>
    %96 = arith.mulf %11, %95 : vector<9x64xf32>
    %97 = arith.addf %93, %96 : vector<9x64xf32>
    %c1_49 = arith.constant 1 : index
    %c6_50 = arith.constant 6 : index
    %98 = memref.load %arg1[%c1_49, %c6_50] : memref<2x10xf32, #tpu.memory_space<smem>>
    %99 = vector.broadcast %98 : f32 to vector<9x64xf32>
    %100 = arith.addf %97, %99 : vector<9x64xf32>
    %101 = vector.shape_cast %100 : vector<9x64xf32> to vector<1x9x64xf32>
    %cst_51 = arith.constant dense<0.000000e+00> : vector<1xf32>
    %102 = vector.multi_reduction <add>, %101, %cst_51 [1, 2] : vector<1x9x64xf32> to vector<1xf32>
    %103 = vector.shape_cast %102 : vector<1xf32> to vector<1x1x1xf32>
    %104 = vector.extract %103[0, 0, 0] : f32 from vector<1x1x1xf32>
    %105 = vector.broadcast %104 : f32 to vector<1x1xf32>
    %cst_52 = arith.constant 0.00173611112 : f32
    %106 = vector.broadcast %cst_52 : f32 to vector<1x1xf32>
    %107 = arith.mulf %105, %106 : vector<1x1xf32>
    %108 = vector.broadcast %107 : vector<1x1xf32> to vector<9x64xf32>
    %109 = arith.subf %100, %108 : vector<9x64xf32>
    %110 = arith.mulf %109, %109 : vector<9x64xf32>
    %111 = vector.shape_cast %110 : vector<9x64xf32> to vector<1x9x64xf32>
    %cst_53 = arith.constant dense<0.000000e+00> : vector<1xf32>
    %112 = vector.multi_reduction <add>, %111, %cst_53 [1, 2] : vector<1x9x64xf32> to vector<1xf32>
    %113 = vector.shape_cast %112 : vector<1xf32> to vector<1x1x1xf32>
    %114 = vector.extract %113[0, 0, 0] : f32 from vector<1x1x1xf32>
    %115 = vector.broadcast %114 : f32 to vector<1x1xf32>
    %cst_54 = arith.constant 0.00173611112 : f32
    %116 = vector.broadcast %cst_54 : f32 to vector<1x1xf32>
    %117 = arith.mulf %115, %116 : vector<1x1xf32>
    %cst_55 = arith.constant 9.99999974E-6 : f32
    %118 = vector.broadcast %cst_55 : f32 to vector<1x1xf32>
    %119 = arith.addf %117, %118 : vector<1x1xf32>
    %120 = math.rsqrt %119 : vector<1x1xf32>
    %121 = vector.broadcast %120 : vector<1x1xf32> to vector<9x64xf32>
    %122 = arith.mulf %109, %121 : vector<9x64xf32>
    %c1_56 = arith.constant 1 : index
    %c7_57 = arith.constant 7 : index
    %123 = memref.load %arg1[%c1_56, %c7_57] : memref<2x10xf32, #tpu.memory_space<smem>>
    %124 = vector.broadcast %123 : f32 to vector<9x64xf32>
    %125 = arith.mulf %122, %124 : vector<9x64xf32>
    %c1_58 = arith.constant 1 : index
    %c8_59 = arith.constant 8 : index
    %126 = memref.load %arg1[%c1_58, %c8_59] : memref<2x10xf32, #tpu.memory_space<smem>>
    %127 = vector.broadcast %126 : f32 to vector<9x64xf32>
    %128 = arith.addf %125, %127 : vector<9x64xf32>
    %cst_60 = arith.constant 0.000000e+00 : f32
    %129 = vector.broadcast %cst_60 : f32 to vector<9x64xf32>
    %130 = arith.cmpf oge, %128, %129 : vector<9x64xf32>
    %c1_61 = arith.constant 1 : index
    %c9_62 = arith.constant 9 : index
    %131 = memref.load %arg1[%c1_61, %c9_62] : memref<2x10xf32, #tpu.memory_space<smem>>
    %132 = vector.broadcast %131 : f32 to vector<9x64xf32>
    %133 = arith.mulf %132, %128 : vector<9x64xf32>
    %134 = arith.select %130, %128, %133 : vector<9x64xi1>, vector<9x64xf32>
    %c0_63 = arith.constant 0 : index
    %c1_64 = arith.constant 1 : index
    %c0_65 = arith.constant 0 : index
    %c0_66 = arith.constant 0 : index
    %135 = vector.load %arg2[%c0_63, %c1_64, %c0_65, %c0_66] : memref<2x2x9x64xf32, #tpu.memory_space<vmem>>, vector<1x1x9x64xf32>
    %136 = vector.shape_cast %135 : vector<1x1x9x64xf32> to vector<9x64xf32>
    %137 = vector.shape_cast %134 : vector<9x64xf32> to vector<1x1x9x64xf32>
    tpu.vector_store %arg2[%c0_63, %c1_64, %c0_65, %c0_66], %137 {strides = array<i32>} : memref<2x2x9x64xf32, #tpu.memory_space<vmem>>, vector<1x1x9x64xf32>,
    %c1_67 = arith.constant 1 : index
    %c0_68 = arith.constant 0 : index
    %c0_69 = arith.constant 0 : index
    %138 = vector.load %arg0[%c1_67, %c0_68, %c0_69] : memref<2x10x66xf32, #tpu.memory_space<vmem>>, vector<1x9x64xf32>
    %139 = vector.shape_cast %138 : vector<1x9x64xf32> to vector<9x64xf32>
    %c1_70 = arith.constant 1 : index
    %c1_71 = arith.constant 1 : index
    %c0_72 = arith.constant 0 : index
    %140 = vector.load %arg0[%c1_70, %c1_71, %c0_72] : memref<2x10x66xf32, #tpu.memory_space<vmem>>, vector<1x9x64xf32>
    %141 = vector.shape_cast %140 : vector<1x9x64xf32> to vector<9x64xf32>
    %c1_73 = arith.constant 1 : index
    %c0_74 = arith.constant 0 : index
    %c1_75 = arith.constant 1 : index
    %142 = vector.load %arg0[%c1_73, %c0_74, %c1_75] : memref<2x10x66xf32, #tpu.memory_space<vmem>>, vector<1x9x64xf32>
    %143 = vector.shape_cast %142 : vector<1x9x64xf32> to vector<9x64xf32>
    %c1_76 = arith.constant 1 : index
    %c1_77 = arith.constant 1 : index
    %c1_78 = arith.constant 1 : index
    %144 = vector.load %arg0[%c1_76, %c1_77, %c1_78] : memref<2x10x66xf32, #tpu.memory_space<vmem>>, vector<1x9x64xf32>
    %145 = vector.shape_cast %144 : vector<1x9x64xf32> to vector<9x64xf32>
    %c1_79 = arith.constant 1 : index
    %c0_80 = arith.constant 0 : index
    %c2_81 = arith.constant 2 : index
    %146 = vector.load %arg0[%c1_79, %c0_80, %c2_81] : memref<2x10x66xf32, #tpu.memory_space<vmem>>, vector<1x9x64xf32>
    %147 = vector.shape_cast %146 : vector<1x9x64xf32> to vector<9x64xf32>
    %c1_82 = arith.constant 1 : index
    %c1_83 = arith.constant 1 : index
    %c2_84 = arith.constant 2 : index
    %148 = vector.load %arg0[%c1_82, %c1_83, %c2_84] : memref<2x10x66xf32, #tpu.memory_space<vmem>>, vector<1x9x64xf32>
    %149 = vector.shape_cast %148 : vector<1x9x64xf32> to vector<9x64xf32>
    %c0_85 = arith.constant 0 : index
    %c0_86 = arith.constant 0 : index
    %150 = memref.load %arg1[%c0_85, %c0_86] : memref<2x10xf32, #tpu.memory_space<smem>>
    %151 = vector.broadcast %150 : f32 to vector<9x64xf32>
    %152 = arith.mulf %139, %151 : vector<9x64xf32>
    %c0_87 = arith.constant 0 : index
    %c1_88 = arith.constant 1 : index
    %153 = memref.load %arg1[%c0_87, %c1_88] : memref<2x10xf32, #tpu.memory_space<smem>>
    %154 = vector.broadcast %153 : f32 to vector<9x64xf32>
    %155 = arith.mulf %141, %154 : vector<9x64xf32>
    %156 = arith.addf %152, %155 : vector<9x64xf32>
    %c0_89 = arith.constant 0 : index
    %c2_90 = arith.constant 2 : index
    %157 = memref.load %arg1[%c0_89, %c2_90] : memref<2x10xf32, #tpu.memory_space<smem>>
    %158 = vector.broadcast %157 : f32 to vector<9x64xf32>
    %159 = arith.mulf %143, %158 : vector<9x64xf32>
    %160 = arith.addf %156, %159 : vector<9x64xf32>
    %c0_91 = arith.constant 0 : index
    %c3_92 = arith.constant 3 : index
    %161 = memref.load %arg1[%c0_91, %c3_92] : memref<2x10xf32, #tpu.memory_space<smem>>
    %162 = vector.broadcast %161 : f32 to vector<9x64xf32>
    %163 = arith.mulf %145, %162 : vector<9x64xf32>
    %164 = arith.addf %160, %163 : vector<9x64xf32>
    %c0_93 = arith.constant 0 : index
    %c4_94 = arith.constant 4 : index
    %165 = memref.load %arg1[%c0_93, %c4_94] : memref<2x10xf32, #tpu.memory_space<smem>>
    %166 = vector.broadcast %165 : f32 to vector<9x64xf32>
    %167 = arith.mulf %147, %166 : vector<9x64xf32>
    %168 = arith.addf %164, %167 : vector<9x64xf32>
    %c0_95 = arith.constant 0 : index
    %c5_96 = arith.constant 5 : index
    %169 = memref.load %arg1[%c0_95, %c5_96] : memref<2x10xf32, #tpu.memory_space<smem>>
    %170 = vector.broadcast %169 : f32 to vector<9x64xf32>
    %171 = arith.mulf %149, %170 : vector<9x64xf32>
    %172 = arith.addf %168, %171 : vector<9x64xf32>
    %c0_97 = arith.constant 0 : index
    %c6_98 = arith.constant 6 : index
    %173 = memref.load %arg1[%c0_97, %c6_98] : memref<2x10xf32, #tpu.memory_space<smem>>
    %174 = vector.broadcast %173 : f32 to vector<9x64xf32>
    %175 = arith.addf %172, %174 : vector<9x64xf32>
    %176 = vector.shape_cast %175 : vector<9x64xf32> to vector<1x9x64xf32>
    %cst_99 = arith.constant dense<0.000000e+00> : vector<1xf32>
    %177 = vector.multi_reduction <add>, %176, %cst_99 [1, 2] : vector<1x9x64xf32> to vector<1xf32>
    %178 = vector.shape_cast %177 : vector<1xf32> to vector<1x1x1xf32>
    %179 = vector.extract %178[0, 0, 0] : f32 from vector<1x1x1xf32>
    %180 = vector.broadcast %179 : f32 to vector<1x1xf32>
    %cst_100 = arith.constant 0.00173611112 : f32
    %181 = vector.broadcast %cst_100 : f32 to vector<1x1xf32>
    %182 = arith.mulf %180, %181 : vector<1x1xf32>
    %183 = vector.broadcast %182 : vector<1x1xf32> to vector<9x64xf32>
    %184 = arith.subf %175, %183 : vector<9x64xf32>
    %185 = arith.mulf %184, %184 : vector<9x64xf32>
    %186 = vector.shape_cast %185 : vector<9x64xf32> to vector<1x9x64xf32>
    %cst_101 = arith.constant dense<0.000000e+00> : vector<1xf32>
    %187 = vector.multi_reduction <add>, %186, %cst_101 [1, 2] : vector<1x9x64xf32> to vector<1xf32>
    %188 = vector.shape_cast %187 : vector<1xf32> to vector<1x1x1xf32>
    %189 = vector.extract %188[0, 0, 0] : f32 from vector<1x1x1xf32>
    %190 = vector.broadcast %189 : f32 to vector<1x1xf32>
    %cst_102 = arith.constant 0.00173611112 : f32
    %191 = vector.broadcast %cst_102 : f32 to vector<1x1xf32>
    %192 = arith.mulf %190, %191 : vector<1x1xf32>
    %cst_103 = arith.constant 9.99999974E-6 : f32
    %193 = vector.broadcast %cst_103 : f32 to vector<1x1xf32>
    %194 = arith.addf %192, %193 : vector<1x1xf32>
    %195 = math.rsqrt %194 : vector<1x1xf32>
    %196 = vector.broadcast %195 : vector<1x1xf32> to vector<9x64xf32>
    %197 = arith.mulf %184, %196 : vector<9x64xf32>
    %c0_104 = arith.constant 0 : index
    %c7_105 = arith.constant 7 : index
    %198 = memref.load %arg1[%c0_104, %c7_105] : memref<2x10xf32, #tpu.memory_space<smem>>
    %199 = vector.broadcast %198 : f32 to vector<9x64xf32>
    %200 = arith.mulf %197, %199 : vector<9x64xf32>
    %c0_106 = arith.constant 0 : index
    %c8_107 = arith.constant 8 : index
    %201 = memref.load %arg1[%c0_106, %c8_107] : memref<2x10xf32, #tpu.memory_space<smem>>
    %202 = vector.broadcast %201 : f32 to vector<9x64xf32>
    %203 = arith.addf %200, %202 : vector<9x64xf32>
    %cst_108 = arith.constant 0.000000e+00 : f32
    %204 = vector.broadcast %cst_108 : f32 to vector<9x64xf32>
    %205 = arith.cmpf oge, %203, %204 : vector<9x64xf32>
    %c0_109 = arith.constant 0 : index
    %c9_110 = arith.constant 9 : index
    %206 = memref.load %arg1[%c0_109, %c9_110] : memref<2x10xf32, #tpu.memory_space<smem>>
    %207 = vector.broadcast %206 : f32 to vector<9x64xf32>
    %208 = arith.mulf %207, %203 : vector<9x64xf32>
    %209 = arith.select %205, %203, %208 : vector<9x64xi1>, vector<9x64xf32>
    %c1_111 = arith.constant 1 : index
    %c0_112 = arith.constant 0 : index
    %c0_113 = arith.constant 0 : index
    %c0_114 = arith.constant 0 : index
    %210 = vector.load %arg2[%c1_111, %c0_112, %c0_113, %c0_114] : memref<2x2x9x64xf32, #tpu.memory_space<vmem>>, vector<1x1x9x64xf32>
    %211 = vector.shape_cast %210 : vector<1x1x9x64xf32> to vector<9x64xf32>
    %212 = vector.shape_cast %209 : vector<9x64xf32> to vector<1x1x9x64xf32>
    tpu.vector_store %arg2[%c1_111, %c0_112, %c0_113, %c0_114], %212 {strides = array<i32>} : memref<2x2x9x64xf32, #tpu.memory_space<vmem>>, vector<1x1x9x64xf32>,
    %c1_115 = arith.constant 1 : index
    %c0_116 = arith.constant 0 : index
    %213 = memref.load %arg1[%c1_115, %c0_116] : memref<2x10xf32, #tpu.memory_space<smem>>
    %214 = vector.broadcast %213 : f32 to vector<9x64xf32>
    %215 = arith.mulf %139, %214 : vector<9x64xf32>
    %c1_117 = arith.constant 1 : index
    %c1_118 = arith.constant 1 : index
    %216 = memref.load %arg1[%c1_117, %c1_118] : memref<2x10xf32, #tpu.memory_space<smem>>
    %217 = vector.broadcast %216 : f32 to vector<9x64xf32>
    %218 = arith.mulf %141, %217 : vector<9x64xf32>
    %219 = arith.addf %215, %218 : vector<9x64xf32>
    %c1_119 = arith.constant 1 : index
    %c2_120 = arith.constant 2 : index
    %220 = memref.load %arg1[%c1_119, %c2_120] : memref<2x10xf32, #tpu.memory_space<smem>>
    %221 = vector.broadcast %220 : f32 to vector<9x64xf32>
    %222 = arith.mulf %143, %221 : vector<9x64xf32>
    %223 = arith.addf %219, %222 : vector<9x64xf32>
    %c1_121 = arith.constant 1 : index
    %c3_122 = arith.constant 3 : index
    %224 = memref.load %arg1[%c1_121, %c3_122] : memref<2x10xf32, #tpu.memory_space<smem>>
    %225 = vector.broadcast %224 : f32 to vector<9x64xf32>
    %226 = arith.mulf %145, %225 : vector<9x64xf32>
    %227 = arith.addf %223, %226 : vector<9x64xf32>
    %c1_123 = arith.constant 1 : index
    %c4_124 = arith.constant 4 : index
    %228 = memref.load %arg1[%c1_123, %c4_124] : memref<2x10xf32, #tpu.memory_space<smem>>
    %229 = vector.broadcast %228 : f32 to vector<9x64xf32>
    %230 = arith.mulf %147, %229 : vector<9x64xf32>
    %231 = arith.addf %227, %230 : vector<9x64xf32>
    %c1_125 = arith.constant 1 : index
    %c5_126 = arith.constant 5 : index
    %232 = memref.load %arg1[%c1_125, %c5_126] : memref<2x10xf32, #tpu.memory_space<smem>>
    %233 = vector.broadcast %232 : f32 to vector<9x64xf32>
    %234 = arith.mulf %149, %233 : vector<9x64xf32>
    %235 = arith.addf %231, %234 : vector<9x64xf32>
    %c1_127 = arith.constant 1 : index
    %c6_128 = arith.constant 6 : index
    %236 = memref.load %arg1[%c1_127, %c6_128] : memref<2x10xf32, #tpu.memory_space<smem>>
    %237 = vector.broadcast %236 : f32 to vector<9x64xf32>
    %238 = arith.addf %235, %237 : vector<9x64xf32>
    %239 = vector.shape_cast %238 : vector<9x64xf32> to vector<1x9x64xf32>
    %cst_129 = arith.constant dense<0.000000e+00> : vector<1xf32>
    %240 = vector.multi_reduction <add>, %239, %cst_129 [1, 2] : vector<1x9x64xf32> to vector<1xf32>
    %241 = vector.shape_cast %240 : vector<1xf32> to vector<1x1x1xf32>
    %242 = vector.extract %241[0, 0, 0] : f32 from vector<1x1x1xf32>
    %243 = vector.broadcast %242 : f32 to vector<1x1xf32>
    %cst_130 = arith.constant 0.00173611112 : f32
    %244 = vector.broadcast %cst_130 : f32 to vector<1x1xf32>
    %245 = arith.mulf %243, %244 : vector<1x1xf32>
    %246 = vector.broadcast %245 : vector<1x1xf32> to vector<9x64xf32>
    %247 = arith.subf %238, %246 : vector<9x64xf32>
    %248 = arith.mulf %247, %247 : vector<9x64xf32>
    %249 = vector.shape_cast %248 : vector<9x64xf32> to vector<1x9x64xf32>
    %cst_131 = arith.constant dense<0.000000e+00> : vector<1xf32>
    %250 = vector.multi_reduction <add>, %249, %cst_131 [1, 2] : vector<1x9x64xf32> to vector<1xf32>
    %251 = vector.shape_cast %250 : vector<1xf32> to vector<1x1x1xf32>
    %252 = vector.extract %251[0, 0, 0] : f32 from vector<1x1x1xf32>
    %253 = vector.broadcast %252 : f32 to vector<1x1xf32>
    %cst_132 = arith.constant 0.00173611112 : f32
    %254 = vector.broadcast %cst_132 : f32 to vector<1x1xf32>
    %255 = arith.mulf %253, %254 : vector<1x1xf32>
    %cst_133 = arith.constant 9.99999974E-6 : f32
    %256 = vector.broadcast %cst_133 : f32 to vector<1x1xf32>
    %257 = arith.addf %255, %256 : vector<1x1xf32>
    %258 = math.rsqrt %257 : vector<1x1xf32>
    %259 = vector.broadcast %258 : vector<1x1xf32> to vector<9x64xf32>
    %260 = arith.mulf %247, %259 : vector<9x64xf32>
    %c1_134 = arith.constant 1 : index
    %c7_135 = arith.constant 7 : index
    %261 = memref.load %arg1[%c1_134, %c7_135] : memref<2x10xf32, #tpu.memory_space<smem>>
    %262 = vector.broadcast %261 : f32 to vector<9x64xf32>
    %263 = arith.mulf %260, %262 : vector<9x64xf32>
    %c1_136 = arith.constant 1 : index
    %c8_137 = arith.constant 8 : index
    %264 = memref.load %arg1[%c1_136, %c8_137] : memref<2x10xf32, #tpu.memory_space<smem>>
    %265 = vector.broadcast %264 : f32 to vector<9x64xf32>
    %266 = arith.addf %263, %265 : vector<9x64xf32>
    %cst_138 = arith.constant 0.000000e+00 : f32
    %267 = vector.broadcast %cst_138 : f32 to vector<9x64xf32>
    %268 = arith.cmpf oge, %266, %267 : vector<9x64xf32>
    %c1_139 = arith.constant 1 : index
    %c9_140 = arith.constant 9 : index
    %269 = memref.load %arg1[%c1_139, %c9_140] : memref<2x10xf32, #tpu.memory_space<smem>>
    %270 = vector.broadcast %269 : f32 to vector<9x64xf32>
    %271 = arith.mulf %270, %266 : vector<9x64xf32>
    %272 = arith.select %268, %266, %271 : vector<9x64xi1>, vector<9x64xf32>
    %c1_141 = arith.constant 1 : index
    %c1_142 = arith.constant 1 : index
    %c0_143 = arith.constant 0 : index
    %c0_144 = arith.constant 0 : index
    %273 = vector.load %arg2[%c1_141, %c1_142, %c0_143, %c0_144] : memref<2x2x9x64xf32, #tpu.memory_space<vmem>>, vector<1x1x9x64xf32>
    %274 = vector.shape_cast %273 : vector<1x1x9x64xf32> to vector<9x64xf32>
    %275 = vector.shape_cast %272 : vector<9x64xf32> to vector<1x1x9x64xf32>
    tpu.vector_store %arg2[%c1_141, %c1_142, %c0_143, %c0_144], %275 {strides = array<i32>} : memref<2x2x9x64xf32, #tpu.memory_space<vmem>>, vector<1x1x9x64xf32>,
    return
  }
}

</mosaic_0001>

<bundles_post_ra>
// kernel: squeeze.1
= control target key start
LH: loop header
LB: loop body
LE: loop exit
PB: predicated region body
PF: predicated region fallthrough
CT: control target
= control target key end

     0   :  { %s11_s10 = smov 3  ;;  %vm13_vm0 = vcmask 15360   ;;  %s23_s11 = smov 3  ;;  %vm20_vm1 = vcmask 48160   ;;  %vm27_vm2 = vcmask 31760   ;;  %s61_s0 = inlined_call_operand.vmem [shape: f32[2,1,3,2], index: 0, kind: input, shape index: {}]   ;;  %s62_s1 = inlined_call_operand.vmem [shape: f32[2,6], index: 1, kind: output, shape index: {}]  }
   0x1   :  { %v37_v0 = vld [vmem:[%s61_s0 + $0x4] sm:$0xf]  ;;  %v9_v1 = vld [vmem:[%s61_s0] sm:$0xf]  ;;  %s16_s0 = smov 3  ;;  %s40_s12 = smov 4  }
   0x2   :  { %8 = vst [vmem:[#allocation1 + $0x8] sm:$0xf] %v37_v0  ;;  %10 = vst [vmem:[#allocation1] sm:$0xf] %v9_v1  ;;  %s41_s13 = smov 2  }
   0x9   :  { %v17_v2 = vld [vmem:[#allocation1 + $0x2] ss:$8 sm:%s16_s0]   ;;  %v12_v3 = vld [vmem:[#allocation1] ss:$8 sm:%s11_s10]   ;;  %v24_v4 = vld [vmem:[#allocation1 + $0x1] ss:$8 sm:%s23_s11]  }
   0xa   :  { %18 = vrot.lane.b32.xlu0 %v17_v2, %s40_s12  ;;  %14 = vst.msk [vmem:[#allocation0] sm:$0x3] %vm13_vm0, %v12_v3  }
   0xe   :  { %25 = vrot.lane.b32.xlu0 %v24_v4, %s41_s13 }
  0x7c   :  { %v19_v5 = vpop.permute.xlu0 %18  }
  0x7d   :  { %21 = vst.msk [vmem:[#allocation0] sm:$0x3] %vm20_vm1, %v19_v5  }
  0x80   :  { %v26_v6 = vpop.permute.xlu0 %25  }
  0x81   :  { %28 = vst.msk [vmem:[#allocation0] sm:$0x3] %vm27_vm2, %v26_v6  }
  0x88   :  { %v33_v7 = vld [vmem:[#allocation0] sm:$0x3] }
  0x89   :  { %36 = vst [vmem:[%s62_s1] sm:$0x3] %v33_v7 }

// kernel: channel_decoder_sf10.1
= control target key start
LH: loop header
LB: loop body
LE: loop exit
PB: predicated region body
PF: predicated region fallthrough
CT: control target
= control target key end

     0   :  { %7 = vsyncpa [#allocation3], 0  ;;  %s991_s0 = inlined_call_operand.vmem [shape: f32[2,10,66], index: 0, kind: input, shape index: {}]   ;;  %s992_s1 = inlined_call_operand.vmem [shape: f32[2,10], index: 1, kind: input, shape index: {}]   ;;  %s993_s2 = inlined_call_operand.vmem [shape: f32[2,2,9,64], index: 2, kind: output, shape index: {}]  }
   0x1   :  { %s16_s11 = sshll.u32 %s992_s1, 4  ;;  %s17_s11 = int_to_ptr.vmem [resolvable:$true] %s16_s11 }
   0x2   :  { %s614_s12 = scalar_lea.vmem %s17_s11, 32  ;;  %p619_p1 = scmp.lt.s32.totalorder %s17_s11, %s17_s11 }
   0x3   :  { %p615_p0 = scmp.ne.s32.totalorder %s17_s11, %s614_s12  ;;  %p620_p2 = scmp.lt.s32.totalorder %s614_s12, %s614_s12 }
   0x5   :  { %p621_p3 = por %p620_p2, %p619_p1 }
   0x7   :  { %p622_p4 = pnand %p621_p3, %p615_p0 }
   0x9   :  { %625 = shalt.err (!%p622_p4)
}
   0xa   :  { %s628_s13 = smov [#allocation2]  }
   0xb   :  { %19 = dma.vmem_to_smem %s17_s11, 32, %s628_s13, [#allocation3]  }
   0xc   :  { %626 = dma.done.wait [#allocation3], 32  }
   0xd   :  { %627 = vsyncadd [#allocation3], 4294967264 }
   0xe   :  { %23 = sfence }
   0xf   :  { %s541_s14 = sld [smem:[#allocation2 + $0x3]]  ;;  %v652_v0 = vld [vmem:[%s991_s0 + $0x1] sm:$0xff]  ;;  %v662_v2 = vld [vmem:[%s991_s0 + $0x9] sm:$0x1]  ;;  %s629_s25 = smov 127   ;;  %vm100_vm0 = vcmask 516096  }
  0x10   :  { %s540_s15 = sld [smem:[#allocation2 + $0x2]]  ;;  %v657_v1 = vld [vmem:[%s991_s0] sm:$0xff]  ;;  %v671_v5 = vld [vmem:[%s991_s0 + $0x8] sm:$0x1]  ;;  %s630_s27 = smov 126   ;;  %vm98_vm1 = vcmask 523264  }
  0x11   :  { %s542_s16 = sld [smem:[#allocation2 + $0x4]] }
  0x12   :  { %s543_s22 = sld [smem:[#allocation2 + $0x5]] }
  0x13   :  { %s550_s26 = sld [smem:[#allocation2 + $0x82]] }
  0x14   :  { %s551_s28 = sld [smem:[#allocation2 + $0x83]] }
  0x15   :  { %v664_v3 = vstv %s541_s14  ;;  %s552_s29 = sld [smem:[#allocation2 + $0x84]] }
  0x16   :  { %v54_v4 = vmul.f32 %v664_v3, %v652_v0  ;;  %v673_v6 = vstv %s540_s15  ;;  %v55_v8 = vmul.f32 %v664_v3, %v662_v2  ;;  %s553_s30 = sld [smem:[#allocation2 + $0x85]] }
  0x17   :  { %v40_v7 = vmul.f32 %v673_v6, %v657_v1  ;;  %v41_v9 = vmul.f32 %v673_v6, %v671_v5  ;;  %v683_v10 = vstv %s542_s16  ;;  %s28_s3 = sld [smem:[#allocation2]] }
  0x18   :  { %58 = vrot.lane.b32.xlu1 %v54_v4, %s629_s25  ;;  %v69_v11 = vmul.f32 %v683_v10, %v671_v5  ;;  %v68_v12 = vmul.f32 %v683_v10, %v657_v1  ;;  %v691_v13 = vstv %s543_s22  ;;  %s539_s4 = sld [smem:[#allocation2 + $0x1]] }
  0x19   :  { %44 = vrot.lane.b32.xlu0 %v40_v7, %s629_s25  ;;  %v83_v14 = vmul.f32 %v691_v13, %v662_v2  ;;  %v82_v15 = vmul.f32 %v691_v13, %v652_v0  ;;  %v701_v16 = vstv %s550_s26  ;;  %s544_s5 = sld [smem:[#allocation2 + $0x6]] }
  0x1a   :  { %v166_v17 = vmul.f32 %v701_v16, %v657_v1  ;;  %v167_v18 = vmul.f32 %v701_v16, %v671_v5  ;;  %v708_v19 = vstv %s551_s28  ;;  %s548_s6 = sld [smem:[#allocation2 + $0x80]] }
  0x1b   :  { %v180_v20 = vmul.f32 %v708_v19, %v652_v0  ;;  %v181_v21 = vmul.f32 %v708_v19, %v662_v2  ;;  %v716_v22 = vstv %s552_s29  ;;  %s549_s7 = sld [smem:[#allocation2 + $0x81]] }
  0x1c   :  { %60 = vrot.lane.b32.xlu1 %v55_v8, %s629_s25  ;;  %v194_v23 = vmul.f32 %v716_v22, %v657_v1  ;;  %v195_v24 = vmul.f32 %v716_v22, %v671_v5  ;;  %v724_v25 = vstv %s553_s30  ;;  %s554_s8 = sld [smem:[#allocation2 + $0x86]] }
  0x1d   :  { %46 = vrot.lane.b32.xlu0 %v41_v9, %s629_s25  ;;  %v208_v26 = vmul.f32 %v724_v25, %v652_v0  ;;  %v209_v27 = vmul.f32 %v724_v25, %v662_v2  ;;  %v733_v28 = vstv %s28_s3  ;;  %s545_s1 = sld [smem:[#allocation2 + $0x7]] }
  0x1e   :  { %v735_v29 = vstv %s539_s4  ;;  %v30_v31 = vmul.f32 %v733_v28, %v657_v1  ;;  %v31_v32 = vmul.f32 %v733_v28, %v671_v5  ;;  %s546_s19 = sld [smem:[#allocation2 + $0x8]] }
  0x1f   :  { %v34_v30 = vmul.f32 %v735_v29, %v652_v0  ;;  %v35_v33 = vmul.f32 %v735_v29, %v662_v2  ;;  %v745_v48 = vstv %s544_s5  ;;  %s547_s20 = sld [smem:[#allocation2 + $0x9]] }
  0x20   :  { %74 = vrot.lane.b32.xlu1 %v69_v11, %s630_s27  ;;  %v751_v60 = vstv %s548_s6  ;;  %s556_s28 = sld [smem:[#allocation2 + $0x88]] }
  0x21   :  { %72 = vrot.lane.b32.xlu0 %v68_v12, %s630_s27  ;;  %v36_v36 = vadd.f32 %v34_v30, %v30_v31  ;;  %v37_v37 = vadd.f32 %v35_v33, %v31_v32  ;;  %v753_v61 = vstv %s549_s7  ;;  %v156_v62 = vmul.f32 %v751_v60, %v657_v1  ;;  %s557_s29 = sld [smem:[#allocation2 + $0x89]] }
  0x22   :  { %v160_v63 = vmul.f32 %v753_v61, %v652_v0  ;;  %v157_v7 = vmul.f32 %v751_v60, %v671_v5  ;;  %v161_v8 = vmul.f32 %v753_v61, %v662_v2 }
  0x24   :  { %88 = vrot.lane.b32.xlu1 %v83_v14, %s630_s27  ;;  %v162_v9 = vadd.f32 %v160_v63, %v156_v62  ;;  %v163_v14 = vadd.f32 %v161_v8, %v157_v7 }
  0x25   :  { %86 = vrot.lane.b32.xlu0 %v82_v15, %s630_s27 }
  0x28   :  { %170 = vrot.lane.b32.xlu1 %v166_v17, %s629_s25 }
  0x2c   :  { %172 = vrot.lane.b32.xlu1 %v167_v18, %s629_s25 }
  0x30   :  { %184 = vrot.lane.b32.xlu1 %v180_v20, %s629_s25 }
  0x34   :  { %186 = vrot.lane.b32.xlu1 %v181_v21, %s629_s25 }
  0x38   :  { %198 = vrot.lane.b32.xlu1 %v194_v23, %s630_s27  ;;  %v763_v23 = vstv %s554_s8 }
  0x3c   :  { %200 = vrot.lane.b32.xlu1 %v195_v24, %s630_s27 }
  0x40   :  { %212 = vrot.lane.b32.xlu1 %v208_v26, %s630_s27 }
  0x44   :  { %214 = vrot.lane.b32.xlu1 %v209_v27, %s630_s27 }
  0x8a   :  { %v59_v34 = vpop.permute.xlu1 %58 }
  0x8b   :  { %v45_v35 = vpop.permute.xlu0 %44 }
  0x8c   :  { %v50_v40 = vadd.f32 %v45_v35, %v36_v36 }
  0x8e   :  { %v61_v38 = vpop.permute.xlu1 %60  ;;  %v64_v45 = vadd.f32 %v59_v34, %v50_v40  ;;  %v778_v34 = vld [vmem:[%s991_s0 + $0x10] sm:$0xff] }
  0x8f   :  { %v47_v39 = vpop.permute.xlu0 %46  ;;  %v324_v35 = vmul.f32 %v778_v34, %v683_v10 }
  0x90   :  { %v51_v41 = vadd.f32 %v47_v39, %v37_v37 }
  0x92   :  { %v75_v42 = vpop.permute.xlu1 %74  ;;  %v65_v43 = vadd.f32 %v61_v38, %v51_v41 }
  0x93   :  { %v73_v44 = vpop.permute.xlu0 %72 }
  0x94   :  { %v79_v46 = vadd.f32 %v75_v42, %v65_v43  ;;  %v78_v47 = vadd.f32 %v73_v44, %v64_v45 }
  0x96   :  { %v89_v49 = vpop.permute.xlu1 %88 }
  0x97   :  { %v93_v50 = vadd.f32 %v89_v49, %v79_v46  ;;  %v87_v51 = vpop.permute.xlu0 %86 }
  0x98   :  { %v92_v52 = vadd.f32 %v87_v51, %v78_v47 }
  0x99   :  { %v97_v53 = vadd.f32 %v745_v48, %v93_v50 }
  0x9a   :  { %v96_v54 = vadd.f32 %v745_v48, %v92_v52  ;;  %v171_v58 = vpop.permute.xlu1 %170 }
  0x9b   :  { %v101_v55 = vsel %vm100_vm0, %v97_v53, 0.0  ;;  %v176_v12 = vadd.f32 %v171_v58, %v162_v9  ;;  %v814_v58 = vld [vmem:[%s991_s0 + $0x19] sm:$0x1] }
  0x9c   :  { %v99_v56 = vsel %vm98_vm1, %v96_v54, 0.0  ;;  %v339_v63 = vmul.f32 %v814_v58, %v691_v13 }
  0x9d   :  { %v102_v57 = vadd.f32 %v101_v55, %v99_v56  ;;  %v296_v55 = vmul.f32 %v778_v34, %v673_v6  ;;  %v806_v56 = vld [vmem:[%s991_s0 + $0x11] sm:$0xff] }
  0x9e   :  { %v173_v59 = vpop.permute.xlu1 %172  ;;  %v338_v62 = vmul.f32 %v806_v56, %v691_v13 }
  0x9f   :  { %103 = vadd.xlane.f32.xlu0 %v102_v57  ;;  %v177_v17 = vadd.f32 %v173_v59, %v163_v14  ;;  %v310_v57 = vmul.f32 %v806_v56, %v664_v3 }
  0xa2   :  { %v185_v4 = vpop.permute.xlu1 %184 }
  0xa3   :  { %v190_v18 = vadd.f32 %v185_v4, %v176_v12 }
  0xa6   :  { %v187_v11 = vpop.permute.xlu1 %186 }
  0xa7   :  { %v191_v1 = vadd.f32 %v187_v11, %v177_v17  ;;  %v286_v17 = vmul.f32 %v778_v34, %v733_v28 }
  0xaa   :  { %v199_v15 = vpop.permute.xlu1 %198 }
  0xab   :  { %v204_v21 = vadd.f32 %v199_v15, %v190_v18  ;;  %v290_v18 = vmul.f32 %v806_v56, %v735_v29 }
  0xae   :  { %v201_v20 = vpop.permute.xlu1 %200 }
  0xaf   :  { %v205_v24 = vadd.f32 %v201_v20, %v191_v1 }
  0xb2   :  { %v213_v0 = vpop.permute.xlu1 %212 }
  0xb3   :  { %v218_v26 = vadd.f32 %v213_v0, %v204_v21  ;;  %v292_v0 = vadd.f32 %v290_v18, %v286_v17 }
  0xb5   :  { %v766_v5 = vadd.f32 %v763_v23, %v218_v26  ;;  %v291_v26 = vmul.f32 %v814_v58, %v735_v29 }
  0xb6   :  { %v215_v2 = vpop.permute.xlu1 %214 }
  0xb7   :  { %v219_v27 = vadd.f32 %v215_v2, %v205_v24  ;;  %v224_v31 = vsel %vm98_vm1, %v766_v5, 0.0 }
  0xb9   :  { %v769_v30 = vadd.f32 %v763_v23, %v219_v27 }
  0xbb   :  { %v225_v32 = vsel %vm100_vm0, %v769_v30, 0.0 }
  0xbc   :  { %v226_v33 = vadd.f32 %v225_v32, %v224_v31 }
  0xbe   :  { %227 = vadd.xlane.f32.xlu1 %v226_v33 }
  0xcf   :  { %328 = vrot.lane.b32.xlu1 %v324_v35, %s630_s27 }
 0x128   :  { %v104_v36 = vpop.xlane.xlu0 %103 }
 0x129   :  { %v105_v37 = vrot.slane %v104_v36, 4 }
 0x12b   :  { %v106_v38 = vadd.f32 %v105_v37, %v104_v36 }
 0x12d   :  { %v107_v39 = vrot.slane %v106_v38, 2 }
 0x12f   :  { %v108_v40 = vadd.f32 %v107_v39, %v106_v38 }
 0x131   :  { %v109_v41 = vrot.slane %v108_v40, 1 }
 0x133   :  { %v110_v42 = vadd.f32 %v109_v41, %v108_v40 }
 0x135   :  { %587 = vpush %v110_v42 }
 0x147   :  { %v228_v4 = vpop.xlane.xlu1 %227 }
 0x148   :  { %v229_v7 = vrot.slane %v228_v4, 4 }
 0x14b   :  { %v329_v38 = vpop.permute.xlu1 %328 }
 0x166   :  { %s588_s11 = spop %587 }
 0x167   :  { %v112_v43 = vstv %s588_s11 }
 0x168   :  { %v113_v44 = vmul.f32 0.0017361111, %v112_v43 }
 0x16a   :  { %v783_v45 = vsub.f32 %v96_v54, %v113_v44  ;;  %v785_v46 = vsub.f32 %v97_v53, %v113_v44  ;;  %v798_v53 = vld [vmem:[%s991_s0 + $0x18] sm:$0x1] }
 0x16b   :  { %v297_v54 = vmul.f32 %v798_v53, %v673_v6  ;;  %v311_v6 = vmul.f32 %v814_v58, %v664_v3  ;;  %v325_v59 = vmul.f32 %v798_v53, %v683_v10  ;;  %v230_v3 = vadd.f32 %v229_v7, %v228_v4 }
 0x16c   :  { %v116_v47 = vmul.f32 %v783_v45, %v783_v45  ;;  %v117_v49 = vmul.f32 %v785_v46, %v785_v46  ;;  %v287_v24 = vmul.f32 %v798_v53, %v733_v28 }
 0x16d   :  { %v231_v8 = vrot.slane %v230_v3, 2 }
 0x16e   :  { %v118_v50 = vsel %vm98_vm1, %v116_v47, 0.0  ;;  %v119_v51 = vsel %vm100_vm0, %v117_v49, 0.0  ;;  %v293_v33 = vadd.f32 %v291_v26, %v287_v24  ;;  %v421_v24 = vmul.f32 %v778_v34, %v701_v16 }
 0x16f   :  { %v120_v52 = vadd.f32 %v119_v51, %v118_v50  ;;  %v232_v10 = vadd.f32 %v231_v8, %v230_v3  ;;  %v435_v26 = vmul.f32 %v806_v56, %v708_v19 }
 0x171   :  { %121 = vadd.xlane.f32.xlu0 %v120_v52  ;;  %v233_v13 = vrot.slane %v232_v10, 1 }
 0x173   :  { %v234_v27 = vadd.f32 %v233_v13, %v232_v10  ;;  %v868_v10 = vstv %s545_s1 }
 0x187   :  { %300 = vrot.lane.b32.xlu0 %v296_v55, %s629_s25  ;;  %v422_v55 = vmul.f32 %v798_v53, %v701_v16  ;;  %v464_v16 = vmul.f32 %v814_v58, %v724_v25 }
 0x18b   :  { %302 = vrot.lane.b32.xlu0 %v297_v54, %s629_s25  ;;  %v449_v54 = vmul.f32 %v778_v34, %v716_v22 }
 0x18f   :  { %314 = vrot.lane.b32.xlu0 %v310_v57, %s629_s25 }
 0x193   :  { %316 = vrot.lane.b32.xlu0 %v311_v6, %s629_s25 }
 0x197   :  { %330 = vrot.lane.b32.xlu0 %v325_v59, %s630_s27 }
 0x19b   :  { %342 = vrot.lane.b32.xlu0 %v338_v62, %s630_s27 }
 0x19f   :  { %344 = vrot.lane.b32.xlu0 %v339_v63, %s630_s27 }
 0x1fa   :  { %v122_v9 = vpop.xlane.xlu0 %121 }
 0x1fb   :  { %v123_v11 = vrot.slane %v122_v9, 4 }
 0x1fd   :  { %v124_v12 = vadd.f32 %v123_v11, %v122_v9 }
 0x1fe   :  { %v301_v14 = vpop.permute.xlu0 %300 }
 0x1ff   :  { %v125_v15 = vrot.slane %v124_v12, 2  ;;  %v306_v32 = vadd.f32 %v301_v14, %v292_v0 }
 0x201   :  { %v126_v20 = vadd.f32 %v125_v15, %v124_v12  ;;  %v872_v15 = vstv %s546_s19 }
 0x202   :  { %v303_v1 = vpop.permute.xlu0 %302 }
 0x203   :  { %v127_v21 = vrot.slane %v126_v20, 1  ;;  %v307_v36 = vadd.f32 %v303_v1, %v293_v33 }
 0x205   :  { %v128_v2 = vadd.f32 %v127_v21, %v126_v20  ;;  %v876_v20 = vstv %s547_s20 }
 0x206   :  { %v315_v31 = vpop.permute.xlu0 %314 }
 0x207   :  { %589 = vpush %v128_v2  ;;  %v320_v37 = vadd.f32 %v315_v31, %v306_v32  ;;  %v436_v2 = vmul.f32 %v814_v58, %v708_v19  ;;  %v415_v19 = vmul.f32 %v806_v56, %v753_v61 }
 0x208   :  { %591 = vpush %v234_v27  ;;  %v450_v27 = vmul.f32 %v798_v53, %v716_v22 }
 0x209   :  { %v334_v41 = vadd.f32 %v329_v38, %v320_v37 }
 0x20a   :  { %v317_v35 = vpop.permute.xlu0 %316 }
 0x20b   :  { %v321_v40 = vadd.f32 %v317_v35, %v307_v36  ;;  %v411_v35 = vmul.f32 %v778_v34, %v751_v60 }
 0x20e   :  { %v331_v39 = vpop.permute.xlu0 %330 }
 0x20f   :  { %v335_v43 = vadd.f32 %v331_v39, %v321_v40  ;;  %v417_v39 = vadd.f32 %v415_v19, %v411_v35  ;;  %v412_v40 = vmul.f32 %v798_v53, %v751_v60 }
 0x212   :  { %v343_v42 = vpop.permute.xlu0 %342 }
 0x213   :  { %v348_v28 = vadd.f32 %v343_v42, %v334_v41 }
 0x215   :  { %v838_v44 = vadd.f32 %v348_v28, %v745_v48 }
 0x216   :  { %v345_v29 = vpop.permute.xlu0 %344 }
 0x217   :  { %v349_v47 = vadd.f32 %v345_v29, %v335_v43  ;;  %v354_v50 = vsel %vm98_vm1, %v838_v44, 0.0 }
 0x219   :  { %v841_v49 = vadd.f32 %v349_v47, %v745_v48  ;;  %v463_v48 = vmul.f32 %v806_v56, %v724_v25  ;;  %v416_v25 = vmul.f32 %v814_v58, %v753_v61 }
 0x21b   :  { %v355_v51 = vsel %vm100_vm0, %v841_v49, 0.0  ;;  %v418_v34 = vadd.f32 %v416_v25, %v412_v40 }
 0x21c   :  { %v356_v52 = vadd.f32 %v355_v51, %v354_v50 }
 0x21e   :  { %357 = vadd.xlane.f32.xlu1 %v356_v52 }
 0x22f   :  { %427 = vrot.lane.b32.xlu1 %v422_v55, %s629_s25 }
 0x233   :  { %453 = vrot.lane.b32.xlu1 %v449_v54, %s630_s27 }
 0x237   :  { %467 = vrot.lane.b32.xlu1 %v463_v48, %s630_s27 }
 0x238   :  { %s590_s0 = spop %589 }
 0x239   :  { %v130_v57 = vstv %s590_s0  ;;  %s592_s18 = spop %591 }
 0x23a   :  { %v131_v6 = vmul.f32 0.0017361111, %v130_v57  ;;  %v236_v59 = vstv %s592_s18 }
 0x23b   :  { %v237_v62 = vmul.f32 0.0017361111, %v236_v59 }
 0x23c   :  { %v132_v63 = vadd.f32 1e-05, %v131_v6 }
 0x23d   :  { %v857_v4 = vsub.f32 %v766_v5, %v237_v62  ;;  %v860_v7 = vsub.f32 %v769_v30, %v237_v62 }
 0x23e   :  { %606 = vrsqrt.f32 %v132_v63 }
 0x23f   :  { %v240_v3 = vmul.f32 %v857_v4, %v857_v4  ;;  %v241_v8 = vmul.f32 %v860_v7, %v860_v7 }
 0x241   :  { %v242_v9 = vsel %vm98_vm1, %v240_v3, 0.0  ;;  %v243_v11 = vsel %vm100_vm0, %v241_v8, 0.0 }
 0x242   :  { %v244_v12 = vadd.f32 %v243_v11, %v242_v9 }
 0x244   :  { %245 = vadd.xlane.f32.xlu0 %v244_v12 }
 0x24b   :  { %v607_v5 = vpop.eup %606 }
 0x24c   :  { %v134_v30 = vmul.f32 %v607_v5, %v783_v45  ;;  %v135_v14 = vmul.f32 %v607_v5, %v785_v46 }
 0x24e   :  { %v138_v17 = vmul.f32 %v868_v10, %v134_v30  ;;  %v139_v18 = vmul.f32 %v868_v10, %v135_v14 }
 0x250   :  { %v142_v13 = vadd.f32 %v872_v15, %v138_v17  ;;  %v143_v1 = vadd.f32 %v872_v15, %v139_v18 }
 0x252   :  { %vm144_vm2 = vcmp.ge.f32.partialorder %v142_v13, 0.0  ;;  %vm145_vm3 = vcmp.ge.f32.partialorder %v143_v1, 0.0  ;;  %v148_v21 = vmul.f32 %v876_v20, %v142_v13  ;;  %v149_v45 = vmul.f32 %v876_v20, %v143_v1 }
 0x254   :  { %v150_v0 = vsel %vm144_vm2, %v142_v13, %v148_v21  ;;  %v151_v46 = vsel %vm145_vm3, %v143_v1, %v149_v45 }
 0x255   :  { %152 = vst.msk [vmem:[%s993_s2] sm:$0xff] %vm98_vm1, %v150_v0 }
 0x256   :  { %153 = vst.msk [vmem:[%s993_s2 + $0x8] sm:$0x1] %vm100_vm0, %v151_v46 }
 0x25a   :  { %425 = vrot.lane.b32.xlu0 %v421_v24, %s629_s25 }
 0x25e   :  { %439 = vrot.lane.b32.xlu0 %v435_v26, %s629_s25 }
 0x262   :  { %441 = vrot.lane.b32.xlu0 %v436_v2, %s629_s25 }
 0x266   :  { %455 = vrot.lane.b32.xlu0 %v450_v27, %s630_s27  ;;  %v939_v27 = vstv %s556_s28 }
 0x26a   :  { %469 = vrot.lane.b32.xlu0 %v464_v16, %s630_s27  ;;  %s555_s27 = sld [smem:[#allocation2 + $0x87]] }
 0x270   :  { %v935_v26 = vstv %s555_s27 }
 0x2a7   :  { %v358_v31 = vpop.xlane.xlu1 %357 }
 0x2a8   :  { %v359_v32 = vrot.slane %v358_v31, 4 }
 0x2aa   :  { %v360_v33 = vadd.f32 %v359_v32, %v358_v31  ;;  %v943_v32 = vstv %s557_s29 }
 0x2ab   :  { %v428_v38 = vpop.permute.xlu1 %427 }
 0x2ac   :  { %v361_v36 = vrot.slane %v360_v33, 2  ;;  %v432_v54 = vadd.f32 %v428_v38, %v418_v34 }
 0x2ae   :  { %v362_v42 = vadd.f32 %v361_v36, %v360_v33 }
 0x2af   :  { %v454_v47 = vpop.permute.xlu1 %453 }
 0x2b0   :  { %v363_v56 = vrot.slane %v362_v42, 1 }
 0x2b2   :  { %v364_v6 = vadd.f32 %v363_v56, %v362_v42 }
 0x2b3   :  { %v468_v53 = vpop.permute.xlu1 %467 }
 0x2cd   :  { %v246_v37 = vpop.xlane.xlu0 %245 }
 0x2ce   :  { %v247_v22 = vrot.slane %v246_v37, 4 }
 0x2d0   :  { %v248_v41 = vadd.f32 %v247_v22, %v246_v37 }
 0x2d1   :  { %v426_v43 = vpop.permute.xlu0 %425 }
 0x2d2   :  { %v249_v28 = vrot.slane %v248_v41, 2  ;;  %v431_v29 = vadd.f32 %v426_v43, %v417_v39 }
 0x2d4   :  { %v250_v50 = vadd.f32 %v249_v28, %v248_v41 }
 0x2d5   :  { %v440_v51 = vpop.permute.xlu0 %439 }
 0x2d6   :  { %v251_v52 = vrot.slane %v250_v50, 1  ;;  %v445_v55 = vadd.f32 %v440_v51, %v431_v29 }
 0x2d8   :  { %v252_v48 = vadd.f32 %v251_v52, %v250_v50  ;;  %v459_v57 = vadd.f32 %v454_v47, %v445_v55 }
 0x2d9   :  { %v442_v60 = vpop.permute.xlu0 %441 }
 0x2da   :  { %593 = vpush %v252_v48  ;;  %v446_v61 = vadd.f32 %v442_v60, %v432_v54  ;;  %v473_v58 = vadd.f32 %v468_v53, %v459_v57 }
 0x2db   :  { %595 = vpush %v364_v6 }
 0x2dc   :  { %v914_v63 = vadd.f32 %v473_v58, %v763_v23 }
 0x2dd   :  { %v456_v59 = vpop.permute.xlu0 %455 }
 0x2de   :  { %v460_v62 = vadd.f32 %v456_v59, %v446_v61  ;;  %v479_v11 = vsel %vm98_vm1, %v914_v63, 0.0 }
 0x2e1   :  { %v470_v3 = vpop.permute.xlu0 %469 }
 0x2e2   :  { %v474_v8 = vadd.f32 %v470_v3, %v460_v62 }
 0x2e4   :  { %v917_v9 = vadd.f32 %v474_v8, %v763_v23 }
 0x2e6   :  { %v480_v12 = vsel %vm100_vm0, %v917_v9, 0.0 }
 0x2e7   :  { %v481_v5 = vadd.f32 %v480_v12, %v479_v11 }
 0x2e9   :  { %482 = vadd.xlane.f32.xlu0 %v481_v5 }
 0x30b   :  { %s594_s25 = spop %593 }
 0x30c   :  { %v254_v30 = vstv %s594_s25  ;;  %s596_s26 = spop %595 }
 0x30d   :  { %v255_v14 = vmul.f32 0.0017361111, %v254_v30  ;;  %v366_v17 = vstv %s596_s26 }
 0x30e   :  { %v367_v18 = vmul.f32 0.0017361111, %v366_v17 }
 0x30f   :  { %v256_v13 = vadd.f32 1e-05, %v255_v14 }
 0x310   :  { %v924_v1 = vsub.f32 %v838_v44, %v367_v18  ;;  %v927_v23 = vsub.f32 %v841_v49, %v367_v18 }
 0x311   :  { %608 = vrsqrt.f32 %v256_v13 }
 0x312   :  { %v370_v21 = vmul.f32 %v924_v1, %v924_v1  ;;  %v371_v45 = vmul.f32 %v927_v23, %v927_v23 }
 0x314   :  { %v372_v0 = vsel %vm98_vm1, %v370_v21, 0.0  ;;  %v373_v46 = vsel %vm100_vm0, %v371_v45, 0.0 }
 0x315   :  { %v374_v24 = vadd.f32 %v373_v46, %v372_v0 }
 0x317   :  { %375 = vadd.xlane.f32.xlu1 %v374_v24 }
 0x31e   :  { %v609_v44 = vpop.eup %608 }
 0x31f   :  { %v258_v49 = vmul.f32 %v609_v44, %v857_v4  ;;  %v259_v2 = vmul.f32 %v609_v44, %v860_v7 }
 0x321   :  { %v262_v16 = vmul.f32 %v935_v26, %v258_v49  ;;  %v263_v31 = vmul.f32 %v935_v26, %v259_v2 }
 0x323   :  { %v266_v33 = vadd.f32 %v939_v27, %v262_v16  ;;  %v267_v35 = vadd.f32 %v939_v27, %v263_v31 }
 0x325   :  { %vm268_vm4 = vcmp.ge.f32.partialorder %v266_v33, 0.0  ;;  %vm269_vm5 = vcmp.ge.f32.partialorder %v267_v35, 0.0  ;;  %v272_v19 = vmul.f32 %v943_v32, %v266_v33  ;;  %v273_v4 = vmul.f32 %v943_v32, %v267_v35 }
 0x327   :  { %v274_v36 = vsel %vm268_vm4, %v266_v33, %v272_v19  ;;  %v275_v7 = vsel %vm269_vm5, %v267_v35, %v273_v4 }
 0x328   :  { %558 = vst.msk [vmem:[%s993_s2 + $0x10] sm:$0xff] %vm98_vm1, %v274_v36 }
 0x329   :  { %559 = vst.msk [vmem:[%s993_s2 + $0x18] sm:$0x1] %vm100_vm0, %v275_v7 }
 0x372   :  { %v483_v37 = vpop.xlane.xlu0 %482 }
 0x373   :  { %v484_v38 = vrot.slane %v483_v37, 4 }
 0x375   :  { %v485_v22 = vadd.f32 %v484_v38, %v483_v37 }
 0x377   :  { %v486_v39 = vrot.slane %v485_v22, 2 }
 0x379   :  { %v487_v42 = vadd.f32 %v486_v39, %v485_v22 }
 0x37b   :  { %v488_v29 = vrot.slane %v487_v42, 1 }
 0x37d   :  { %v489_v50 = vadd.f32 %v488_v29, %v487_v42 }
 0x3a0   :  { %v376_v40 = vpop.xlane.xlu1 %375 }
 0x3a1   :  { %v377_v25 = vrot.slane %v376_v40, 4 }
 0x3a3   :  { %v378_v41 = vadd.f32 %v377_v25, %v376_v40 }
 0x3a5   :  { %v379_v43 = vrot.slane %v378_v41, 2 }
 0x3a7   :  { %v380_v28 = vadd.f32 %v379_v43, %v378_v41 }
 0x3a9   :  { %v381_v34 = vrot.slane %v380_v28, 1 }
 0x3ab   :  { %v382_v47 = vadd.f32 %v381_v34, %v380_v28 }
 0x3ad   :  { %597 = vpush %v382_v47 }
 0x3ae   :  { %599 = vpush %v489_v50 }
 0x3de   :  { %s598_s6 = spop %597 }
 0x3df   :  { %v384_v56 = vstv %s598_s6  ;;  %s600_s7 = spop %599 }
 0x3e0   :  { %v385_v51 = vmul.f32 0.0017361111, %v384_v56  ;;  %v491_v52 = vstv %s600_s7 }
 0x3e1   :  { %v492_v55 = vmul.f32 0.0017361111, %v491_v52 }
 0x3e2   :  { %v386_v54 = vadd.f32 1e-05, %v385_v51 }
 0x3e3   :  { %v493_v48 = vsub.f32 %v914_v63, %v492_v55  ;;  %v494_v57 = vsub.f32 %v917_v9, %v492_v55 }
 0x3e4   :  { %610 = vrsqrt.f32 %v386_v54 }
 0x3e5   :  { %v495_v6 = vmul.f32 %v493_v48, %v493_v48  ;;  %v496_v60 = vmul.f32 %v494_v57, %v494_v57 }
 0x3e7   :  { %v497_v53 = vsel %vm98_vm1, %v495_v6, 0.0  ;;  %v498_v61 = vsel %vm100_vm0, %v496_v60, 0.0 }
 0x3e8   :  { %v499_v58 = vadd.f32 %v498_v61, %v497_v53 }
 0x3ea   :  { %500 = vadd.xlane.f32.xlu0 %v499_v58 }
 0x3f1   :  { %v611_v59 = vpop.eup %610 }
 0x3f2   :  { %v388_v62 = vmul.f32 %v611_v59, %v924_v1  ;;  %v389_v3 = vmul.f32 %v611_v59, %v927_v23 }
 0x3f4   :  { %v392_v8 = vmul.f32 %v388_v62, %v868_v10  ;;  %v393_v63 = vmul.f32 %v389_v3, %v868_v10 }
 0x3f6   :  { %v396_v9 = vadd.f32 %v392_v8, %v872_v15  ;;  %v397_v11 = vadd.f32 %v393_v63, %v872_v15 }
 0x3f8   :  { %vm398_vm6 = vcmp.ge.f32.partialorder %v396_v9, 0.0  ;;  %vm399_vm7 = vcmp.ge.f32.partialorder %v397_v11, 0.0  ;;  %v402_v12 = vmul.f32 %v396_v9, %v876_v20  ;;  %v403_v5 = vmul.f32 %v397_v11, %v876_v20 }
 0x3fa   :  { %v404_v30 = vsel %vm398_vm6, %v396_v9, %v402_v12  ;;  %v405_v14 = vsel %vm399_vm7, %v397_v11, %v403_v5 }
 0x3fb   :  { %573 = vst.msk [vmem:[%s993_s2 + $0x20] sm:$0xff] %vm98_vm1, %v404_v30 }
 0x3fc   :  { %574 = vst.msk [vmem:[%s993_s2 + $0x28] sm:$0x1] %vm100_vm0, %v405_v14 }
 0x473   :  { %v501_v10 = vpop.xlane.xlu0 %500 }
 0x474   :  { %v502_v15 = vrot.slane %v501_v10, 4 }
 0x476   :  { %v503_v17 = vadd.f32 %v502_v15, %v501_v10 }
 0x478   :  { %v504_v18 = vrot.slane %v503_v17, 2 }
 0x47a   :  { %v505_v13 = vadd.f32 %v504_v18, %v503_v17 }
 0x47c   :  { %v506_v1 = vrot.slane %v505_v13, 1 }
 0x47e   :  { %v507_v23 = vadd.f32 %v506_v1, %v505_v13 }
 0x480   :  { %601 = vpush %v507_v23 }
 0x4b1   :  { %s602_s12 = spop %601 }
 0x4b2   :  { %v509_v20 = vstv %s602_s12 }
 0x4b3   :  { %v510_v21 = vmul.f32 0.0017361111, %v509_v20 }
 0x4b5   :  { %v511_v45 = vadd.f32 1e-05, %v510_v21 }
 0x4b7   :  { %612 = vrsqrt.f32 %v511_v45 }
 0x4c4   :  { %v613_v0 = vpop.eup %612 }
 0x4c5   :  { %v513_v46 = vmul.f32 %v613_v0, %v493_v48  ;;  %v514_v24 = vmul.f32 %v613_v0, %v494_v57 }
 0x4c7   :  { %v517_v44 = vmul.f32 %v513_v46, %v935_v26  ;;  %v518_v49 = vmul.f32 %v514_v24, %v935_v26 }
 0x4c9   :  { %v521_v2 = vadd.f32 %v517_v44, %v939_v27  ;;  %v522_v16 = vadd.f32 %v518_v49, %v939_v27 }
 0x4cb   :  { %vm523_vm8 = vcmp.ge.f32.partialorder %v521_v2, 0.0  ;;  %vm524_vm9 = vcmp.ge.f32.partialorder %v522_v16, 0.0  ;;  %v527_v31 = vmul.f32 %v521_v2, %v943_v32  ;;  %v528_v33 = vmul.f32 %v522_v16, %v943_v32 }
 0x4cd   :  { %v529_v35 = vsel %vm523_vm8, %v521_v2, %v527_v31  ;;  %v530_v19 = vsel %vm524_vm9, %v522_v16, %v528_v33 }
 0x4ce   :  { %585 = vst.msk [vmem:[%s993_s2 + $0x30] sm:$0xff] %vm98_vm1, %v529_v35 }
 0x4cf   :  { %586 = vst.msk [vmem:[%s993_s2 + $0x38] sm:$0x1] %vm100_vm0, %v530_v19 }
 0x4d0   :  { %538 = vsyncpa [#allocation3], 1 }

</bundles_post_ra>
